<compile_context>
chip_gen: v6e
topology: v6e:2x2x1
jax: 0.10.0
libtpu: 0.0.40
codegen_flags: <defaults>
</compile_context>

<pallas_src>
import math
import functools

import jax
import jax.numpy as jnp
from jax import lax
from jax.experimental import pallas as pl
from jax.experimental.pallas import tpu as pltpu


def _round_up(a, b):
    return (a + b - 1) // b * b


def _projection_kernel(x_ref, w_ref, b_ref, o_ref, m_ref, l_ref, *, nv, tv):
    """One (row-block i, vocab-block j) grid step.

    x_ref: (tm, D)   mxu_dtype  -- resident across the vocab axis
    w_ref: (D, tv)   mxu_dtype  -- streamed
    b_ref: (1, tv)   f32        -- streamed
    o_ref: (tm, Vp)  out_dtype  -- resident across the vocab axis
    m_ref, l_ref: (tm, 1) f32   -- online log-sum-exp state
    """
    j = pl.program_id(1)

    @pl.when(j == 0)
    def _init():
        m_ref[...] = jnp.full(m_ref.shape, -jnp.inf, m_ref.dtype)
        l_ref[...] = jnp.zeros(l_ref.shape, l_ref.dtype)

    # MXU matmul with f32 accumulation; bias add in f32.
    logits = jnp.dot(x_ref[...], w_ref[...],
                     preferred_element_type=jnp.float32)
    logits = logits + b_ref[...]

    # Online (streaming) log-sum-exp over vocab tiles.
    m_prev = m_ref[...]
    m_new = jnp.maximum(m_prev, jnp.max(logits, axis=-1, keepdims=True))
    scale = jnp.exp(m_prev - m_new)                      # == 0 on the first tile
    l_ref[...] = l_ref[...] * scale + jnp.sum(jnp.exp(logits - m_new),
                                              axis=-1, keepdims=True)
    m_ref[...] = m_new

    # Stream this tile's raw logits straight into the resident output block
    # (128-aligned, lane-dense store).  No separate (nv, tm, tv) stash.
    col = pl.multiple_of(j * tv, 128)
    o_ref[:, pl.ds(col, tv)] = logits.astype(o_ref.dtype)

    # Finalize: subtract lse from every tile of the resident block exactly once
    # (read-modify-write in f32).
    # TODO(synk): for very large vocabularies on v7x (64 MiB VMEM / TC), prefer
    # the two-pass streaming-correction design (emit raw (tm, tv) logit blocks
    # plus a (tm, 1) lse output here, subtract in a second fully-pipelined
    # pallas_call) so no (tm, V) block must stay resident and this epilogue is
    # hidden by the pipeline.
    @pl.when(j == nv - 1)
    def _finalize():
        lse = m_ref[...] + jnp.log(l_ref[...])

        def body(k, carry):
            start = pl.multiple_of(k * tv, 128)
            raw = o_ref[:, pl.ds(start, tv)].astype(jnp.float32)
            o_ref[:, pl.ds(start, tv)] = (raw - lse).astype(o_ref.dtype)
            return carry

        lax.fori_loop(0, nv, body, 0)


def make_projection_layer(weight, bias, *, tm=256, tv=512,
                          out_dtype=jnp.bfloat16, mxu_dtype=jnp.bfloat16):
    """Build a forward fn computing log_softmax(x @ weight + bias, axis=-1).

    weight: (d_model, vocab) -- transpose of PyTorch nn.Linear's (vocab, d_model)
    bias:   (vocab,)

    The bf16 cast and vocab padding of the parameters are done ONCE here so the
    per-call forward path never re-materializes the full weight in HBM.
    """
    D, V = weight.shape

    # Vocab tiling: tv_eff is a multiple of 128 (or the full padded vocab).
    tv_eff = min(tv, _round_up(V, 128))
    vp = _round_up(V, tv_eff)
    nv = vp // tv_eff

    w = weight.astype(mxu_dtype)
    b2d = bias.astype(jnp.float32).reshape(1, V)
    if vp != V:
        # Padded vocab columns get a very negative *finite* bias so they add
        # nothing to the log-sum-exp and never produce inf - inf -> NaN.
        w = jnp.pad(w, ((0, 0), (0, vp - V)))
        b2d = jnp.pad(b2d, ((0, 0), (0, vp - V)), constant_values=-1e30)

    kernel = functools.partial(_projection_kernel, nv=nv, tv=tv_eff)
    out_bytes = jnp.dtype(out_dtype).itemsize
    in_bytes = jnp.dtype(mxu_dtype).itemsize

    @jax.jit
    def forward(x):
        # TODO(synk): the module's host-side debug print
        # (`print(f'Projection layer input shape: ...')`) is intentionally omitted.
        B, S, Dx = x.shape
        assert Dx == D, f"d_model mismatch: {Dx} vs {D}"
        M = B * S

        # Row tile: (8, 128)-aligned; keep >= 2 row blocks whenever M > 8 so
        # the "parallel" grid axis can shard across v7x's two TensorCores.
        m8 = _round_up(max(M, 8), 8)
        tm_eff = min(tm, m8)
        if m8 > 8 and m8 <= tm_eff:
            tm_eff = _round_up((m8 + 1) // 2, 8)
        mp = _round_up(m8, tm_eff)

        x2d = x.reshape(M, D).astype(mxu_dtype)
        if mp != M:
            x2d = jnp.pad(x2d, ((0, mp - M), (0, 0)))

        # VMEM budget from the actual footprint (double-buffered streamed
        # inputs + resident output block + LSE scratch) with 50% headroom.
        # Never pin this to physical VMEM (v7x has only 64 MiB per TC).
        est = (2 * (tm_eff * D + D * tv_eff) * in_bytes   # x & weight (2x buffered)
               + 2 * tv_eff * 4                           # bias (2x buffered)
               + 2 * tm_eff * vp * out_bytes              # resident output block
               + 2 * tm_eff * 4)                          # m / l scratch
        vmem_limit = int(min(max(est * 3 // 2, 16 * 1024 * 1024),
                             96 * 1024 * 1024))

        out2d = pl.pallas_call(
            kernel,
            out_shape=jax.ShapeDtypeStruct((mp, vp), out_dtype),
            grid_spec=pltpu.PrefetchScalarGridSpec(
                num_scalar_prefetch=0,
                grid=(mp // tm_eff, nv),                  # reduction (vocab) axis last
                in_specs=[
                    pl.BlockSpec((tm_eff, D), lambda i, j: (i, 0)),   # x row tile
                    # If the weight DMA is still exposed after retuning tm, add
                    # pipeline_mode=pl.Buffered(3) to this spec.
                    pl.BlockSpec((D, tv_eff), lambda i, j: (0, j)),   # weight tile
                    pl.BlockSpec((1, tv_eff), lambda i, j: (0, j)),   # bias tile
                ],
                # Output block resident across the vocab axis; raw logits are
                # streamed into it each step, corrected on the last step.
                out_specs=pl.BlockSpec((tm_eff, vp), lambda i, j: (i, 0)),
                scratch_shapes=[
                    pltpu.VMEM((tm_eff, 1), jnp.float32),   # running max
                    pltpu.VMEM((tm_eff, 1), jnp.float32),   # running sum
                ],
            ),
            compiler_params=pltpu.CompilerParams(
                dimension_semantics=("parallel", "arbitrary"),
                vmem_limit_bytes=vmem_limit,
            ),
        )(x2d, w, b2d)

        return out2d[:M, :V].reshape(B, S, V)

    return forward


if __name__ == "__main__":
    # Small shapes consistent with the module's forward: (batch, seq, d_model).
    batch, seq, d_model, vocab_size = 2, 8, 64, 512

    key = jax.random.PRNGKey(0)
    kx, kw, kb = jax.random.split(key, 3)

    x = jax.random.normal(kx, (batch, seq, d_model), dtype=jnp.float32)

    # nn.Linear-style uniform(-1/sqrt(fan_in), +1/sqrt(fan_in)) init.
    bound = 1.0 / math.sqrt(d_model)
    weight = jax.random.uniform(kw, (d_model, vocab_size), jnp.float32,
                                minval=-bound, maxval=bound)
    bias = jax.random.uniform(kb, (vocab_size,), jnp.float32,
                              minval=-bound, maxval=bound)

    # tv=256 so the demo exercises the tiled-vocab online-LSE + finalize path
    # (2 vocab tiles); the row axis splits into 2 blocks (megacore path).
    proj = make_projection_layer(weight, bias, tm=256, tv=256)
    out = jax.block_until_ready(proj(x))

    # Reference in plain JAX (f32).
    ref = jax.nn.log_softmax(x @ weight + bias, axis=-1)
    assert out.shape == (batch, seq, vocab_size)
    assert out.dtype == jnp.bfloat16
    err = float(jnp.max(jnp.abs(out.astype(jnp.float32) - ref)))
    assert err < 7.5e-2, f"max abs error too large: {err}"

    print("KERNEL_OK")
</pallas_src>

<mosaic_0001>
module attributes {stable_mosaic.version = 11 : i64} {
  func.func @_projection_kernel(%arg0: i32, %arg1: i32, %arg2: memref<8x64xbf16, #tpu.memory_space<vmem>>, %arg3: memref<64x256xbf16, #tpu.memory_space<vmem>>, %arg4: memref<1x256xf32, #tpu.memory_space<vmem>>, %arg5: memref<8x512xbf16, #tpu.memory_space<vmem>>, %arg6: memref<8x1xf32, #tpu.memory_space<vmem>>, %arg7: memref<8x1xf32, #tpu.memory_space<vmem>>) attributes {dimension_semantics = [#tpu.dimension_semantics<parallel>, #tpu.dimension_semantics<arbitrary>], iteration_bounds = array<i64: 2, 2>, scalar_prefetch = 0 : i64, scratch_operands = 2 : i64, tpu.core_type = #tpu.core_type<tc>, window_params = [{transform_indices = @transform_0, window_bounds = array<i64: 8, 64>}, {transform_indices = @transform_1, window_bounds = array<i64: 64, 256>}, {transform_indices = @transform_2, window_bounds = array<i64: 1, 256>}, {transform_indices = @transform_3, window_bounds = array<i64: 8, 512>}]} {
    %c0_i32 = arith.constant 0 : i32
    %0 = arith.cmpi eq, %arg1, %c0_i32 : i32
    %1 = arith.extui %0 : i1 to i32
    %c0_i32_0 = arith.constant 0 : i32
    %2 = arith.cmpi ne, %1, %c0_i32_0 : i32
    scf.if %2 {
      %cst_18 = arith.constant 0xFF800000 : f32
      %33 = vector.broadcast %cst_18 : f32 to vector<8x1xf32>
      %c0_19 = arith.constant 0 : index
      %c0_20 = arith.constant 0 : index
      %34 = vector.load %arg6[%c0_19, %c0_20] : memref<8x1xf32, #tpu.memory_space<vmem>>, vector<8x1xf32>
      tpu.vector_store %arg6[%c0_19, %c0_20], %33 {strides = array<i32>} : memref<8x1xf32, #tpu.memory_space<vmem>>, vector<8x1xf32>,
      %cst_21 = arith.constant 0.000000e+00 : f32
      %35 = vector.broadcast %cst_21 : f32 to vector<8x1xf32>
      %c0_22 = arith.constant 0 : index
      %c0_23 = arith.constant 0 : index
      %36 = vector.load %arg7[%c0_22, %c0_23] : memref<8x1xf32, #tpu.memory_space<vmem>>, vector<8x1xf32>
      tpu.vector_store %arg7[%c0_22, %c0_23], %35 {strides = array<i32>} : memref<8x1xf32, #tpu.memory_space<vmem>>, vector<8x1xf32>,
    } else {
    }
    %c0 = arith.constant 0 : index
    %c0_1 = arith.constant 0 : index
    %3 = vector.load %arg2[%c0, %c0_1] : memref<8x64xbf16, #tpu.memory_space<vmem>>, vector<8x64xbf16>
    %c0_2 = arith.constant 0 : index
    %c0_3 = arith.constant 0 : index
    %4 = vector.load %arg3[%c0_2, %c0_3] : memref<64x256xbf16, #tpu.memory_space<vmem>>, vector<64x256xbf16>
    %cst = arith.constant dense<0.000000e+00> : vector<8x256xf32>
    %5 = tpu.matmul %3, %4, %cst {dimension_numbers = #tpu.dot_dimension_numbers<[1], [0], [0], [1], [0, 0, 1, 1], [], []>} : vector<8x64xbf16>, vector<64x256xbf16>, vector<8x256xf32> -> vector<8x256xf32>
    %c0_4 = arith.constant 0 : index
    %c0_5 = arith.constant 0 : index
    %6 = vector.load %arg4[%c0_4, %c0_5] : memref<1x256xf32, #tpu.memory_space<vmem>>, vector<1x256xf32>
    %7 = vector.broadcast %6 : vector<1x256xf32> to vector<8x256xf32>
    %8 = arith.addf %5, %7 : vector<8x256xf32>
    %c0_6 = arith.constant 0 : index
    %c0_7 = arith.constant 0 : index
    %9 = vector.load %arg6[%c0_6, %c0_7] : memref<8x1xf32, #tpu.memory_space<vmem>>, vector<8x1xf32>
    %cst_8 = arith.constant dense<0xFF800000> : vector<8xf32>
    %10 = vector.multi_reduction <maximumf>, %8, %cst_8 [1] : vector<8x256xf32> to vector<8xf32>
    %11 = vector.shape_cast %10 : vector<8xf32> to vector<8x1xf32>
    %12 = arith.maximumf %9, %11 : vector<8x1xf32>
    %13 = arith.subf %9, %12 : vector<8x1xf32>
    %14 = math.exp %13 : vector<8x1xf32>
    %c0_9 = arith.constant 0 : index
    %c0_10 = arith.constant 0 : index
    %15 = vector.load %arg7[%c0_9, %c0_10] : memref<8x1xf32, #tpu.memory_space<vmem>>, vector<8x1xf32>
    %16 = arith.mulf %15, %14 : vector<8x1xf32>
    %17 = vector.broadcast %12 : vector<8x1xf32> to vector<8x256xf32>
    %18 = arith.subf %8, %17 : vector<8x256xf32>
    %19 = math.exp %18 : vector<8x256xf32>
    %cst_11 = arith.constant dense<0.000000e+00> : vector<8xf32>
    %20 = vector.multi_reduction <add>, %19, %cst_11 [1] : vector<8x256xf32> to vector<8xf32>
    %21 = vector.shape_cast %20 : vector<8xf32> to vector<8x1xf32>
    %22 = arith.addf %16, %21 : vector<8x1xf32>
    %c0_12 = arith.constant 0 : index
    %c0_13 = arith.constant 0 : index
    %23 = vector.load %arg7[%c0_12, %c0_13] : memref<8x1xf32, #tpu.memory_space<vmem>>, vector<8x1xf32>
    tpu.vector_store %arg7[%c0_12, %c0_13], %22 {strides = array<i32>} : memref<8x1xf32, #tpu.memory_space<vmem>>, vector<8x1xf32>,
    %c0_14 = arith.constant 0 : index
    %c0_15 = arith.constant 0 : index
    %24 = vector.load %arg6[%c0_14, %c0_15] : memref<8x1xf32, #tpu.memory_space<vmem>>, vector<8x1xf32>
    tpu.vector_store %arg6[%c0_14, %c0_15], %12 {strides = array<i32>} : memref<8x1xf32, #tpu.memory_space<vmem>>, vector<8x1xf32>,
    %c256_i32 = arith.constant 256 : i32
    %25 = arith.muli %arg1, %c256_i32 : i32
    %26 = tpu.assume_multiple %25, 128 : i32
    %27 = arith.truncf %8 : vector<8x256xf32> to vector<8x256xbf16>
    %c0_16 = arith.constant 0 : index
    %28 = arith.index_cast %26 : i32 to index
    %29 = vector.load %arg5[%c0_16, %28] : memref<8x512xbf16, #tpu.memory_space<vmem>>, vector<8x256xbf16>
    tpu.vector_store %arg5[%c0_16, %28], %27 {strides = array<i32>} : memref<8x512xbf16, #tpu.memory_space<vmem>>, vector<8x256xbf16>,
    %c1_i32 = arith.constant 1 : i32
    %30 = arith.cmpi eq, %arg1, %c1_i32 : i32
    %31 = arith.extui %30 : i1 to i32
    %c0_i32_17 = arith.constant 0 : i32
    %32 = arith.cmpi ne, %31, %c0_i32_17 : i32
    scf.if %32 {
      %c0_18 = arith.constant 0 : index
      %c0_19 = arith.constant 0 : index
      %33 = vector.load %arg6[%c0_18, %c0_19] : memref<8x1xf32, #tpu.memory_space<vmem>>, vector<8x1xf32>
      %c0_20 = arith.constant 0 : index
      %c0_21 = arith.constant 0 : index
      %34 = vector.load %arg7[%c0_20, %c0_21] : memref<8x1xf32, #tpu.memory_space<vmem>>, vector<8x1xf32>
      %35 = math.log %34 : vector<8x1xf32>
      %36 = arith.addf %33, %35 : vector<8x1xf32>
      %c0_i32_22 = arith.constant 0 : i32
      %c2_i32 = arith.constant 2 : i32
      %37 = arith.addi %c0_i32_22, %c2_i32 : i32
      %c1_i32_23 = arith.constant 1 : i32
      scf.for %arg8 = %c0_i32_22 to %37 step %c1_i32_23  : i32 {
        %c256_i32_25 = arith.constant 256 : i32
        %38 = arith.muli %arg8, %c256_i32_25 : i32
        %39 = tpu.assume_multiple %38, 128 : i32
        %c0_26 = arith.constant 0 : index
        %40 = arith.index_cast %39 : i32 to index
        %41 = vector.load %arg5[%c0_26, %40] : memref<8x512xbf16, #tpu.memory_space<vmem>>, vector<8x256xbf16>
        %42 = arith.extf %41 : vector<8x256xbf16> to vector<8x256xf32>
        %43 = vector.broadcast %36 : vector<8x1xf32> to vector<8x256xf32>
        %44 = arith.subf %42, %43 : vector<8x256xf32>
        %45 = arith.truncf %44 : vector<8x256xf32> to vector<8x256xbf16>
        %c0_27 = arith.constant 0 : index
        %46 = arith.index_cast %39 : i32 to index
        %47 = vector.load %arg5[%c0_27, %46] : memref<8x512xbf16, #tpu.memory_space<vmem>>, vector<8x256xbf16>
        tpu.vector_store %arg5[%c0_27, %46], %45 {strides = array<i32>} : memref<8x512xbf16, #tpu.memory_space<vmem>>, vector<8x256xbf16>,
      }
      %c2_i32_24 = arith.constant 2 : i32
    } else {
    }
    return
  }
  func.func @transform_0(%arg0: i32, %arg1: i32) -> (i32, i32) {
    %c0_i32 = arith.constant 0 : i32
    %c0_i32_0 = arith.constant 0 : i32
    return %arg0, %c0_i32 : i32, i32
  }
  func.func @transform_1(%arg0: i32, %arg1: i32) -> (i32, i32) {
    %c0_i32 = arith.constant 0 : i32
    %c0_i32_0 = arith.constant 0 : i32
    return %c0_i32, %arg1 : i32, i32
  }
  func.func @transform_2(%arg0: i32, %arg1: i32) -> (i32, i32) {
    %c0_i32 = arith.constant 0 : i32
    %c0_i32_0 = arith.constant 0 : i32
    return %c0_i32, %arg1 : i32, i32
  }
  func.func @transform_3(%arg0: i32, %arg1: i32) -> (i32, i32) {
    %c0_i32 = arith.constant 0 : i32
    %c0_i32_0 = arith.constant 0 : i32
    return %arg0, %c0_i32 : i32, i32
  }
}

</mosaic_0001>

<bundles_post_ra>
// kernel: forward.1
= control target key start
LH: loop header
LB: loop body
LE: loop exit
PB: predicated region body
PF: predicated region fallthrough
CT: control target
= control target key end

     0   :  { %8 = vsyncpa [#allocation5], 0  ;;  %s1141_s0 = inlined_call_operand.vmem [shape: bf16[16,64], index: 0, kind: input, shape index: {}]   ;;  %s1142_s1 = inlined_call_operand.hbm [shape: bf16[64,512], index: 1, kind: input, shape index: {}]   ;;  %s1143_s2 = inlined_call_operand.vmem [shape: f32[1,512], index: 2, kind: input, shape index: {}]   ;;  %s1144_s3 = inlined_call_operand.hbm [shape: bf16[16,512], index: 3, kind: output, shape index: {}]  }
   0x1   :  { %10 = vsyncpa [#allocation5 + $0x1], 0 }
   0x2   :  { %11 = vsyncpa [#allocation6], 0 }
   0x3   :  { %13 = vsyncpa [#allocation6 + $0x1], 0  ;;  %s923_s12 = smov 0   ;;  %s925_s13 = smov 0  }
   0x4   :  { %s927_s14 = smov 0   ;;  %s929_s15 = smov 0  }
   0x5   :  { %s931_s16 = smov 0   ;;  %s933_s17 = smov 0  }
   0x6   :  { %s935_s18 = smov 0   ;;  %s937_s19 = smov 0  }
   0x7   :  { %s939_s20 = smov 0   ;;  %s941_s21 = smov 0  }
   0x8   :  { %s943_s22 = smov 0  }
   0x9 LB: > { %1148 = sst [smem:[#allocation10_spill]] %s884_s21  ;;  %s559_s23 = sadd.s32 4294967295, %s888_s22   ;;  %s888_s22 = sphi %s943_s22, %s19_s22   ;;  %s884_s21 = sphi %s941_s21, %s1158_s21   ;;  %s880_s20 = sphi %s939_s20, %s1166_s20   ;;  %s876_s19 = sphi %s937_s19, %s1156_s19   ;;  %s872_s18 = sphi %s935_s18, %s1165_s18   ;;  %s868_s17 = sphi %s933_s17, %s1164_s17   ;;  %s864_s16 = sphi %s931_s16, %s1163_s16   ;;  %s860_s15 = sphi %s929_s15, %s1162_s15   ;;  %s856_s14 = sphi %s927_s14, %s1161_s14   ;;  %s852_s13 = sphi %s925_s13, %s1160_s13   ;;  %s848_s12 = sphi %s923_s12, %s1159_s12  }
   0xa   : > { %s560_s24 = sadd.s32 4294967294, %s888_s22   ;;  %s28_s25 = sadd.s32 1, %s880_s20 }
   0xb   : > { %s31_s26 = sadd.s32 1, %s884_s21  ;;  %p29_p0 = scmp.ge.s32.totalorder %s28_s25, 2 }
   0xc   : > { %s64_s27 = sadd.s32 1, %s868_s17  ;;  %p71_p1 = scmp.ne.s32.totalorder %s868_s17, %s864_s16 }
   0xd   : > { %p72_p2 = scmp.eq.s32.totalorder %s888_s22, 0  ;;  %s1168_s25 = smov (%p29_p0, %s28_s25), 0 }
   0xe   : > { %1149 = sst [smem:[#allocation11_spill]] %s1168_s25  ;;  %s1170_s26 = smov (!%p29_p0, %s31_s26), %s884_s21 }
   0xf   : > { %s61_s28 = ssub.s32 %s880_s20, %s1168_s25  ;;  %p989_p3 = por %p72_p2, %p71_p1 }
  0x10   : > { %p33_p4 = scmp.ge.s32.totalorder %s1170_s26, 2  ;;  %p62_p5 = scmp.eq.s32.totalorder %s61_s28, 0 }
  0x11   : > { %p77_p6 = scmp.ne.s32.totalorder %s864_s16, %s860_s15  ;;  %p78_p7 = scmp.eq.s32.totalorder %s559_s23, 0 }
  0x12   : > { %s1172_s26 = smov (%p33_p4, %s1170_s26), 0  ;;  %s116_s6 = sadd.s32 1, %s856_s14 }
  0x13   : > { %1151 = sst [smem:[#allocation12_spill]] %s1172_s26  ;;  %p999_p8 = por %p78_p7, %p77_p6 }
  0x14   : > { %s997_s30 = scalar_select %p62_p5, %s868_s17, %s64_s27  }
  0x15   : > { %s113_s5 = ssub.s32 %s884_s21, %s1172_s26  ;;  %p126_p10 = scmp.ne.s32.totalorder %s856_s14, %s852_s13 }
  0x16   : > { %p114_p9 = scmp.eq.s32.totalorder %s113_s5, 0  ;;  %p127_p11 = scmp.eq.s32.totalorder %s559_s23, 3 }
  0x17   : > { %p132_p13 = scmp.ne.s32.totalorder %s852_s13, %s848_s12  ;;  %p133_p0 = scmp.eq.s32.totalorder %s560_s24, 3 }
  0x18   : > { %s1009_s7 = scalar_select %p114_p9, %s856_s14, %s116_s6  }
  0x19   : > { %p1011_p12 = por %p127_p11, %p126_p10  ;;  %p609_p1 = scmp.lt.s32.totalorder %s888_s22, 4 }
  0x1a   : > { %s160_s9 = sand.u32 1, %s868_s17   ;;  %p1019_p2 = por %p133_p0, %p132_p13 }
  0x1b   : > { %s563_s11 = sshll.u32 %s160_s9, 6  ;;  %s593_s15 = sshll.u32 %s880_s20, 7 }
  0x1c   : > { %s170_s23 = scalar_lea.hbm %s1142_s1, %s593_s15  ;;  %s164_s5 = scalar_lea.vmem [#allocation4], %s563_s11 }
  0x1d   : > { %s171_s6 = sshll.u32 %s164_s5, 4  ;;  %p1029_p4 = pnand %p609_p1, %p989_p3  ;;  %s172_s6 = int_to_ptr.vmem [resolvable:$true] %s171_s6 }
  0x1e   : > { %p566_p5 = scmp.ge.s32.totalorder %s888_s22, 1  ;;  %s161_s24 = scalar_lea.sflag [#allocation5], %s160_s9 }
  0x1f   : > { %p738_p6 = pneg %p1029_p4  ;;  %s749_s25 = scalar_lea.vmem %s172_s6, 1024 }
  0x20   : > { %p750_p7 = scmp.ne.s32.totalorder %s172_s6, %s749_s25  ;;  %s894_s21 = smov [#allocation4]  }
  0x21   : > { %s754_s27 = sshll.u32 %s894_s21, 4  ;;  %s755_s27 = int_to_ptr.vmem [resolvable:$false] %s754_s27 }
  0x22   : > { %p752_p9 = pnand %p750_p7, %p738_p6  ;;  %s756_s11 = scalar_lea.vmem %s755_s27, 2048 }
  0x23   : > { %p757_p11 = scmp.lt.s32.totalorder %s172_s6, %s755_s27  ;;  %p758_p13 = scmp.lt.s32.totalorder %s756_s11, %s749_s25 }
  0x24   : > { %p753_p10 = pneg %p752_p9 }
  0x25   : > { %p759_p3 = por %p758_p13, %p757_p11 }
  0x27   : > { %p760_p0 = pnand %p759_p3, %p753_p10 }
  0x29   : > { %763 = shalt.err (!%p760_p0)
}
  0x2a   : > { %s895_s29 = smov 256   ;;  %s896_s9 = smov 128  }
  0x2b   : > { %s897_s15 = smov 8   ;;  %p187_p1 = scmp.lt.s32.totalorder %s888_s22, 5 }
  0x2c   : > { %604 = dma.hbm_to_vmem [thread:$0]  (!%p1029_p4), %s170_s23, 1024, %s172_s6, %s161_s24, %s895_s29, %s896_s9, %s897_s15  }
  0x2d   : > { %p188_p6 = pnand %p566_p5, %p187_p1 }
  0x2e   : > { %s193_s21 = sand.u32 (!%p188_p6), 1, %s864_s16  }
  0x2f   : > { %191 = sbr.rel (%p188_p6) target bundleno = 887 (0x377), region = 32  ;;  %s567_s28 = sshll.u32 (!%p188_p6), %s193_s21, 6 }
  0x30   : > { %s194_s25 = scalar_lea.sflag (!%p188_p6), [#allocation5], %s193_s21  ;;  %s1042_s5 = scalar_lea.vmem (!%p188_p6), [#allocation4], %s567_s28 }
  0x34   : > { %839 = dma.done.wait (%p999_p8), %s194_s25, 1024  }
  0x35   : > { %841 = vsyncadd (%p999_p8), %s194_s25, 4294966272  ;;  %s225_s26 = sand.u32 1, %s852_s13   ;;  %p228_p4 = scmp.lt.s32.totalorder %s876_s19, 1 }
  0x36   : > { %s568_s23 = sshll.u32 %s225_s26, 4  ;;  %s570_s6 = sshll.u32 %s872_s18, 1 }
  0x37   : > { %p234_p5 = scmp.lt.s32.totalorder %s570_s6, 3  ;;  %s1063_s28 = scalar_lea.vmem [#allocation7], %s568_s23 }
  0x38   : > { %s229_s24 = scalar_select %p228_p4, %s876_s19, 1 }
  0x39   : > { %s1174_s6 = smov (!%p234_p5, %s570_s6), 3  ;;  %p571_p8 = scmp.ne.s32.totalorder %s872_s18, 0 }
  0x3a   : > { %s569_s27 = sshll.u32 %s229_s24, 2  ;;  %s236_s21 = scalar_lea.vmem %s1143_s2, %s1174_s6 }
  0x3b   : > { %s231_s4 = scalar_lea.vmem %s1141_s0, %s569_s27  ;;  %242 = sbr.rel (%p571_p8) target bundleno = 66 (0x42), region = 40 }
  0x40   : > { %vm243_vm0 = vcmask 7168   ;;  %v898_v0 = vmov -inf   ;;  %v899_v1 = vmov 0.0  }
  0x41   : > { %244 = vst.msk [vmem:[#allocation2] sm:$0xff] %vm243_vm0, %v898_v0  ;;  %245 = vst.msk [vmem:[#allocation3] sm:$0xff] %vm243_vm0, %v899_v1 }
  0x42 PF: > { %v715_v2 = vld [vmem:[%s1042_s5 + $0x34] ss:$8 sps:$4 sm:$0xff]   ;;  %v717_v3 = vld [vmem:[%s1042_s5 + $0x30] ss:$8 sps:$4 sm:$0xff]   ;;  %v900_v4 = vmov 0   ;;  %vm307_vm1 = vcmask 523264   ;;  %v257_v12 = vlaneseq }
  0x43   : > { %343 = vmatprep.mubr.bf16.mxu0 %v900_v4  ;;  %714 = vset.pattern.permute.xlu0 %v900_v4  ;;  %v718_v5 = vld [vmem:[%s1042_s5 + $0x24] ss:$8 sps:$4 sm:$0xff]   ;;  %v720_v6 = vld [vmem:[%s1042_s5 + $0x20] ss:$8 sps:$4 sm:$0xff]   ;;  %v721_v7 = vld [vmem:[%s1042_s5 + $0x14] ss:$8 sps:$4 sm:$0xff]  }
  0x44   : > { %319 = vmatprep.subr.bf16.mxu0 %v715_v2  ;;  %v723_v8 = vld [vmem:[%s1042_s5 + $0x10] ss:$8 sps:$4 sm:$0xff]   ;;  %v724_v9 = vld [vmem:[%s1042_s5 + $0x4] ss:$8 sps:$4 sm:$0xff]   ;;  %v726_v10 = vld [vmem:[%s1042_s5] ss:$8 sps:$4 sm:$0xff]  }
  0x45   : > { %320 = vmatpush1.bf16.msra.mxu0 %v717_v3  ;;  %v246_v11 = vld [vmem:[%s231_s4] sm:$0xf]  ;;  %v258_v13 = vshrl.u32 %v257_v12, 7  ;;  %s581_s25 = sshll.u32 %s872_s18, 8  ;;  %vm377_vm2 = vcmask 7168   ;;  %p584_p7 = scmp.ne.s32.totalorder %s872_s18, 1 }
  0x46   : > { %321 = vmatprep.subr.bf16.mxu0 %v718_v5  ;;  %v255_v16 = vld [vmem:[%s236_s21] sm:$0x3]  ;;  %s389_s27 = sshra.s32 %s581_s25, 7  ;;  %s890_s6 = smov (!%p584_p7), 0  }
  0x47   : > { %v259_v14 = vsub.s32 0, %v258_v13  ;;  %v263_v15 = vsub.s32 1, %v258_v13  ;;  %s583_s5 = sshll.u32 %s389_s27, 2 }
  0x48   : > { %s392_s11 = scalar_lea.vmem %s1063_s28, %s583_s5 [#allocation7]  ;;  %v352_v27 = vld [vmem:[#allocation2] sm:$0xff]  ;;  %v360_v41 = vld [vmem:[#allocation3] sm:$0xff] }
  0x49   : > { %322 = vmatpush1.bf16.msra.mxu0 %v720_v6  ;;  %v260_v17 = vrot.slane %v255_v16, %v259_v14  ;;  %v264_v18 = vrot.slane %v255_v16, %v263_v15 }
  0x4a   : > { %323 = vmatprep.subr.bf16.mxu0 %v721_v7 }
  0x4d   : > { %324 = vmatpush1.bf16.msra.mxu0 %v723_v8 }
  0x4e   : > { %325 = vmatprep.subr.bf16.mxu0 %v724_v9 }
  0x51   : > { %326 = vmatpush1.bf16.msra.mxu0 %v726_v10 }
  0x54   : > { %580 = vmatmul.mubr.msk.bf16.vlgmr.msra.gmra.mxu0 %vm307_vm1, %v246_v11 }
 0x114   : > { %v345_v19 = vpop.f32.mrf.mxu0 }
 0x115   : > { %v346_v21 = vadd.f32 %v345_v19, %v260_v17 }
 0x116   : > { %v347_v20 = vpop.f32.mrf.mxu0 }
 0x117   : > { %v348_v22 = vadd.f32 %v347_v20, %v264_v18 }
 0x118   : > { %v349_v23 = vpop.f32.mrf.mxu0 }
 0x119   : > { %v594_v24 = vpack.c.bf16 %v348_v22, %v346_v21  ;;  %v353_v25 = vmax.f32 %v346_v21, %v348_v22 }
 0x11a   : > { %v350_v26 = vpop.f32.mrf.mxu0 }
 0x11b   : > { %393 = vst [vmem:[%s392_s11] sm:$0xff] %v594_v24  ;;  %354 = vmax.xlane.f32.xlu0 %v353_v25 }
 0x1a4   : > { %v355_v28 = vpop.xlane.xlu0 %354 }
 0x1a5   : > { %v356_v29 = vmax.f32 %v352_v27, %v355_v28 }
 0x1a7   : > { %v357_v30 = vsub.f32 %v352_v27, %v356_v29  ;;  %379 = vst.msk [vmem:[#allocation2] sm:$0xff] %vm377_vm2, %v356_v29  ;;  %364 = vperm.xlu0 %714, %v356_v29  }
 0x1a9   : > { %v358_v39 = vmul.f32 1.442695, %v357_v30 }
 0x222   : > { %v365_v31 = vpop.permute.xlu0 %364 }
 0x223   : > { %v367_v32 = vsub.f32 %v346_v21, %v365_v31  ;;  %v368_v33 = vsub.f32 %v348_v22, %v365_v31 }
 0x225   : > { %v369_v34 = vmul.f32 1.442695, %v367_v32  ;;  %v371_v35 = vmul.f32 1.442695, %v368_v33 }
 0x227   : > { %727 = vpow2.f32 %v369_v34 }
 0x228   : > { %729 = vpow2.f32 %v371_v35 }
 0x229   : > { %731 = vpow2.f32 %v358_v39 }
 0x234   : > { %v728_v36 = vpop.eup %727 }
 0x235   : > { %v730_v37 = vpop.eup %729 }
 0x236   : > { %v373_v38 = vadd.f32 %v730_v37, %v728_v36  ;;  %v732_v40 = vpop.eup %731 }
 0x237   : > { %v361_v42 = vmul.f32 %v732_v40, %v360_v41 }
 0x238   : > { %374 = vadd.xlane.f32.xlu1 %v373_v38 }
 0x2c0   : > { %397 = sbr.rel (%p584_p7) target bundleno = 864 (0x360), region = 44 }
 0x2c1   : > { %v375_v43 = vpop.xlane.xlu1 %374 }
 0x2c2   : > { %v376_v44 = vadd.f32 %v375_v43, %v361_v42 }
 0x2c4   : > { %378 = vst.msk [vmem:[#allocation3] sm:$0xff] %vm377_vm2, %v376_v44 }
 0x2c5   : > { %v398_v47 = vld [vmem:[#allocation2] sm:$0xff] }
 0x2cb   : > { %v399_v45 = vld [vmem:[#allocation3] sm:$0xff] }
 0x2cc   : > { %733 = vlog2.f32 %v399_v45 }
 0x2d9   : > { %v734_v46 = vpop.eup %733 }
 0x2da   : > { %v401_v48 = vmul.f32 0.6931472, %v734_v46 }
 0x2dc   : > { %v402_v49 = vadd.f32 %v401_v48, %v398_v47 }
 0x2dd LB: >> { %v901_v50 = vmov 0   ;;  %s585_s29 = sshll.u32 %s892_s6, 8  ;;  %s408_s6 = sadd.s32 1, %s892_s6   ;;  %s892_s6 = sphi %s890_s6, %s408_s6  }
 0x2de   : >> { %735 = vset.pattern.permute.xlu0 %v901_v50  ;;  %s410_s4 = sshra.s32 %s585_s29, 7  ;;  %p405_p9 = scmp.ge.s32.totalorder %s408_s6, 2  }
 0x2df   : >> { %419 = vperm.xlu0 %735, %v402_v49   ;;  %s586_s9 = sshll.u32 %s410_s4, 2 }
 0x2e0   : >> { %s413_s15 = scalar_lea.vmem %s1063_s28, %s586_s9 [#allocation7] }
 0x2e1   : >> { %v414_v51 = vld [vmem:[%s413_s15] sm:$0xff] }
 0x2e2   : >> { %v415_v52 = vunpack.c.l.bf16 %v414_v51  ;;  %v416_v53 = vunpack.c.h.bf16 %v414_v51 }
 0x35a   : >> { %v420_v54 = vpop.permute.xlu0 %419 }
 0x35b   : >> { %v422_v55 = vsub.f32 %v415_v52, %v420_v54  ;;  %v423_v56 = vsub.f32 %v416_v53, %v420_v54  ;;  %407 = sbr.rel (!%p405_p9) target bundleno = 733 (0x2dd), region = 100 }
 0x35d   : >> { %v595_v57 = vpack.c.bf16 %v423_v56, %v422_v55 }
 0x35f   : >> { %432 = vst [vmem:[%s413_s15] sm:$0xff] %v595_v57 }
 0x360 PF: > { %s596_s18 = sshll.u32 %s876_s19, 8  ;;  %s448_s24 = sshll.u32 %s1063_s28, 4  ;;  %s449_s24 = int_to_ptr.vmem [resolvable:$true] %s448_s24 }
 0x361   : > { %s446_s23 = scalar_lea.hbm %s1144_s3, %s596_s18  ;;  %s434_s27 = scalar_lea.sflag [#allocation6], %s225_s26 }
 0x362   : > { %s764_s5 = scalar_lea.vmem %s449_s24, 256  ;;  %s902_s11 = smov [#allocation7]  }
 0x363   : > { %p765_p10 = scmp.ne.s32.totalorder %s449_s24, %s764_s5  ;;  %s768_s6 = sshll.u32 %s902_s11, 4  ;;  %s769_s6 = int_to_ptr.vmem [resolvable:$false] %s768_s6 }
 0x364   : > { %s770_s29 = scalar_lea.vmem %s769_s6, 512  ;;  %p771_p3 = scmp.lt.s32.totalorder %s449_s24, %s769_s6 }
 0x365   : > { %p766_p11 = pnand %p765_p10, %p1011_p12  ;;  %p772_p0 = scmp.lt.s32.totalorder %s770_s29, %s764_s5 }
 0x367   : > { %p767_p13 = pneg %p766_p11  ;;  %p773_p1 = por %p772_p0, %p771_p3 }
 0x369   : > { %p774_p6 = pnand %p773_p1, %p767_p13 }
 0x36b   : > { %777 = shalt.err (!%p774_p6)
}
 0x36c   : > { %s778_s19 = scalar_lea.hbm %s446_s23, 256  ;;  %s782_s4 = scalar_lea.hbm %s1144_s3, 512 }
 0x36d   : > { %p779_p4 = scmp.ne.s32.totalorder %s446_s23, %s778_s19  ;;  %p783_p7 = scmp.lt.s32.totalorder %s446_s23, %s1144_s3 }
 0x36e   : > { %p784_p9 = scmp.lt.s32.totalorder %s782_s4, %s778_s19 }
 0x36f   : > { %p780_p5 = pnand %p779_p4, %p1011_p12 }
 0x370   : > { %p785_p10 = por %p784_p9, %p783_p7 }
 0x371   : > { %p781_p8 = pneg %p780_p5 }
 0x373   : > { %p786_p11 = pnand %p785_p10, %p781_p8 }
 0x375   : > { %789 = shalt.err (!%p786_p11)
}
 0x376   : > { %599 = dma.vmem_to_hbm [thread:$0]  (%p1011_p12), %s449_s24, 256, %s446_s23, %s434_s27  }
 0x377 PF: > { %p610_p13 = scmp.ge.s32.totalorder %s888_s22, 2  ;;  %s460_s18 = sand.u32 1, %s848_s12  }
 0x378   : > { %s461_s21 = scalar_lea.sflag [#allocation6], %s460_s18 }
 0x379   : > { %p606_p3 = pnand %p610_p13, %p1019_p2 }
 0x37b   : > { %p607_p0 = pneg %p606_p3 }
 0x37d   : > { %843 = dma.done.wait (%p607_p0), %s461_s21, 256  }
 0x37e   : > { %845 = vsyncadd (%p607_p0), %s461_s21, 4294967040  ;;  %s19_s22 = sadd.s32 1, %s888_s22   ;;  %s1156_s19 = sld [smem:[#allocation10_spill]] }
 0x37f   : > { %p16_p1 = scmp.ge.s32.totalorder %s19_s22, 6   ;;  %s1157_s8 = sld [smem:[#allocation11_spill]] }
 0x380   : > { %s1158_s21 = sld [smem:[#allocation12_spill]]  ;;  %s1159_s12 = smov %s852_s13 }
 0x381   : > { %s1160_s13 = smov %s856_s14  ;;  %s1161_s14 = smov %s1009_s7 }
 0x382   : > { %s1162_s15 = smov %s864_s16  ;;  %s1163_s16 = smov %s868_s17 }
 0x383   : > { %s1164_s17 = smov %s997_s30  ;;  %s1165_s18 = smov %s880_s20 }
 0x384   :  { %18 = sbr.rel (!%p16_p1) target bundleno = 9 (0x9), region = 111 }
 0x385   : > { %s1166_s20 = smov %s1157_s8 }
 0x389   :  { %466 = vsyncpa [#allocation5], 1 }
 0x38a   :  { %468 = vsyncpa [#allocation5 + $0x1], 1 }
 0x38b   :  { %469 = vsyncpa [#allocation6], 1 }
 0x38c   :  { %471 = vsyncpa [#allocation6 + $0x1], 1 }

</bundles_post_ra>
